<compile_context>
chip_gen: v7x
topology: tpu7x:2x2x1
jax: 0.10.0
libtpu: 0.0.40
codegen_flags: <defaults>
</compile_context>

<pallas_src>
import functools

import jax
import jax.numpy as jnp
from jax.experimental import pallas as pl
from jax.experimental.pallas import tpu as pltpu


def _contrast_loss_kernel(lab_col_ref, lab_row_ref, x_ref, loss_ref, acc_ref,
                          *, temperature, mode):
    k = pl.program_id(0)

    @pl.when(k == 0)
    def _init():
        acc_ref[...] = jnp.zeros_like(acc_ref)

    xc = x_ref[...].astype(jnp.float32)               # (B, TD) feature chunk

    if mode in ("l2", "cos"):
        # Gram accumulation; contraction on last dims -> no transpose, MXU-fed
        # with the lane-major layout x already has, f32 accumulation.
        acc_ref[...] += jax.lax.dot_general(
            xc, xc,
            dimension_numbers=(((1,), (1,)), ((), ())),
            preferred_element_type=jnp.float32)
    elif mode == "l1":
        # Chunked L1 distance: only a (B, B, TD) slab is live, never (B, B, D).
        diff = xc[:, None, :] - xc[None, :, :]
        acc_ref[...] += jnp.sum(jnp.abs(diff), axis=-1)
    else:
        raise ValueError(mode)

    @pl.when(k == pl.num_programs(0) - 1)
    def _finalize():
        g = acc_ref[...]                               # (B, B)
        B = g.shape[0]

        lab_col = lab_col_ref[...]                     # (B, 1)
        lab_row = lab_row_ref[...]                     # (1, B) transposed host-side
        city = (lab_col == lab_row).astype(jnp.float32)

        row_i = jax.lax.broadcasted_iota(jnp.int32, (B, B), 0)
        col_i = jax.lax.broadcasted_iota(jnp.int32, (B, B), 1)
        eye = row_i == col_i

        if mode == "l1":
            logits = g * temperature
        else:
            # ||x_i||^2 in both orientations straight off the Gram diagonal:
            # no (B,1) -> (1,B) transpose inside the kernel.
            diag = jnp.where(eye, g, 0.0)
            sq_col = jnp.sum(diag, axis=1, keepdims=True)   # (B, 1)
            sq_row = jnp.sum(diag, axis=0, keepdims=True)   # (1, B)
            if mode == "l2":
                d2 = jnp.maximum(sq_col + sq_row - 2.0 * g, 0.0)
                logits = jnp.sqrt(d2) * temperature
            else:  # cos: g_ij / (||x_i|| ||x_j||), matches F.normalize + matmul
                inv = (jax.lax.rsqrt(jnp.maximum(sq_col, 1e-24)) *
                       jax.lax.rsqrt(jnp.maximum(sq_row, 1e-24)))
                logits = (g * inv) / temperature

        # Softmax over -logits restricted to off-diagonal entries, WITHOUT
        # forming the normalized (B,B) probability matrix:
        #   pos_i = num_i / den_i   =>   log(pos_i) = log(num_i) - log(den_i)
        # Diagonal masked once with a large finite negative; exp underflows to
        # exactly 0 there, so no extra wheres on e / city are needed.
        neg = jnp.where(eye, -1e30, -logits)
        m = jnp.max(neg, axis=1, keepdims=True)
        e = jnp.exp(neg - m)                           # diag -> 0 exactly
        den = jnp.sum(e, axis=1, keepdims=True)        # (B, 1)
        num = jnp.sum(e * city, axis=1, keepdims=True) # (B, 1), diag term is 0

        valid = num > 0.0
        log_pos = jnp.log(jnp.where(valid, num, 1.0)) - jnp.log(den)
        log_sum = jnp.sum(jnp.where(valid, log_pos, 0.0))
        count = jnp.sum(valid.astype(jnp.float32))
        mean_log = log_sum / count   # NaN if no positive pairs (torch.mean of empty)

        loss_ref[0, 0] = mean_log if mode == "cos" else -mean_log


def contrast_feature_loss(features, labels, *, temperature=0.1, mode="l2",
                          d_chunk=None):
    """features: (B, D) float; labels: (B,) or (B, 1) city ids."""
    features = jnp.asarray(features, jnp.float32)
    B, D = features.shape
    # NOTE: label equality compared in f32 like torch; exact for integer ids.
    lab_col = jnp.asarray(labels).reshape(B, 1).astype(jnp.float32)
    lab_row = lab_col.reshape(1, B)   # host-side transpose: free layout plumbing

    # Tile the feature (contraction) dim so the per-step VMEM working set stays
    # bounded (l1's slab is (B, B, TD)).  Zero-padding D is harmless for all
    # three modes (adds 0 to squares, gram, |diff| and norms).
    if d_chunk is None:
        d_chunk = 128 if mode == "l1" else 512
    if D <= d_chunk:
        td, x = D, features
    else:
        td = max(128, (int(d_chunk) // 128) * 128)    # keep last dim lane-aligned
        pad = (-D) % td
        x = jnp.pad(features, ((0, 0), (0, pad))) if pad else features
    nk = x.shape[1] // td

    kernel = functools.partial(
        _contrast_loss_kernel, temperature=float(temperature), mode=mode)

    out = pl.pallas_call(
        kernel,
        out_shape=jax.ShapeDtypeStruct((1, 1), jnp.float32),
        grid_spec=pltpu.PrefetchScalarGridSpec(
            num_scalar_prefetch=0,
            grid=(nk,),
            in_specs=[
                pl.BlockSpec((B, 1), lambda k: (0, 0)),    # labels, column form
                pl.BlockSpec((1, B), lambda k: (0, 0)),    # labels, row form
                pl.BlockSpec((B, td), lambda k: (0, k)),   # feature D-chunk
            ],
            out_specs=pl.BlockSpec((1, 1), lambda k: (0, 0),
                                   memory_space=pltpu.MemorySpace.SMEM),
            scratch_shapes=[pltpu.VMEM((B, B), jnp.float32)],
        ),
        compiler_params=pltpu.CompilerParams(
            dimension_semantics=("arbitrary",)),
        # TODO(synk): for very large B, add a row-block grid axis marked
        # "parallel" (per-block partial log-sums reduced in the wrapper) so
        # v7x's second TensorCore is used.
    )(lab_col, lab_row, x)
    return out[0, 0]


def _reference_loss(features, labels, temperature=0.1, mode="l2"):
    """Pure-JAX reference mirroring the PyTorch forward (for validation)."""
    features = jnp.asarray(features, jnp.float32)
    labels = jnp.asarray(labels).reshape(-1)
    B = labels.shape[0]
    city = (labels[None, :] == labels[:, None]).astype(jnp.float32)
    if mode == "l2":
        d2 = jnp.sum((features[:, None, :] - features[None, :, :]) ** 2, -1)
        logits = jnp.sqrt(jnp.maximum(d2, 0.0)) * temperature
    elif mode == "l1":
        logits = jnp.sum(jnp.abs(features[:, None, :] - features[None, :, :]),
                         -1) * temperature
    else:
        xn = features / jnp.linalg.norm(features, axis=1, keepdims=True)
        logits = (xn @ xn.T) / temperature
    off = ~jnp.eye(B, dtype=bool)
    lab_off = city[off].reshape(B, B - 1)
    sim_off = logits[off].reshape(B, B - 1)
    p = jax.nn.softmax(-sim_off, axis=1)
    pos = jnp.sum(p * lab_off, axis=1)
    valid = pos > 0
    mean_log = jnp.sum(
        jnp.where(valid, jnp.log(jnp.where(valid, pos, 1.0)), 0.0)) / jnp.sum(valid)
    return mean_log if mode == "cos" else -mean_log


if __name__ == "__main__":
    key = jax.random.PRNGKey(0)
    kf, kl, kf2 = jax.random.split(key, 3)

    # Small shapes consistent with the module: batch x feature_dim, city ids.
    B, D = 8, 32
    features = jax.random.normal(kf, (B, D), dtype=jnp.float32)
    labels = jax.random.randint(kl, (B, 1), 0, 3)   # 3 cities -> positives exist

    for mode in ("l2", "l1", "cos"):
        loss = contrast_feature_loss(features, labels, temperature=0.1, mode=mode)
        jax.block_until_ready(loss)
        ref = _reference_loss(features, labels, temperature=0.1, mode=mode)
        assert jnp.allclose(loss, ref, rtol=1e-4, atol=1e-4), (mode, loss, ref)

    # Exercise the multi-chunk (gridded contraction) path, including padding.
    D2 = 160
    features2 = jax.random.normal(kf2, (B, D2), dtype=jnp.float32)
    for mode in ("l2", "l1"):
        loss = contrast_feature_loss(features2, labels, temperature=0.1,
                                     mode=mode, d_chunk=128)
        jax.block_until_ready(loss)
        ref = _reference_loss(features2, labels, temperature=0.1, mode=mode)
        assert jnp.allclose(loss, ref, rtol=1e-4, atol=1e-4), (mode, loss, ref)

    print("KERNEL_OK")
</pallas_src>

<mosaic_0001>
module attributes {stable_mosaic.version = 11 : i64} {
  func.func @_contrast_loss_kernel(%arg0: i32, %arg1: memref<8x1xf32, #tpu.memory_space<vmem>>, %arg2: memref<1x8xf32, #tpu.memory_space<vmem>>, %arg3: memref<8x32xf32, #tpu.memory_space<vmem>>, %arg4: memref<1x1xf32, #tpu.memory_space<smem>>, %arg5: memref<8x8xf32, #tpu.memory_space<vmem>>) attributes {dimension_semantics = [#tpu.dimension_semantics<arbitrary>], iteration_bounds = array<i64: 1>, scalar_prefetch = 0 : i64, scratch_operands = 1 : i64, tpu.core_type = #tpu.core_type<tc>, window_params = [{pipeline_mode = #tpu.pipeline_mode<synchronous>, transform_indices = @transform_0, window_bounds = array<i64: 8, 1>}, {pipeline_mode = #tpu.pipeline_mode<synchronous>, transform_indices = @transform_1, window_bounds = array<i64: 1, 8>}, {transform_indices = @transform_2, window_bounds = array<i64: 8, 32>}, {transform_indices = @transform_3, window_bounds = array<i64: 1, 1>}]} {
    %c0_i32 = arith.constant 0 : i32
    %0 = arith.cmpi eq, %arg0, %c0_i32 : i32
    %1 = arith.extui %0 : i1 to i32
    %c0_i32_0 = arith.constant 0 : i32
    %2 = arith.cmpi ne, %1, %c0_i32_0 : i32
    scf.if %2 {
      %cst_8 = arith.constant 0.000000e+00 : f32
      %11 = vector.broadcast %cst_8 : f32 to vector<8x8xf32>
      %c0_9 = arith.constant 0 : index
      %c0_10 = arith.constant 0 : index
      %12 = vector.load %arg5[%c0_9, %c0_10] : memref<8x8xf32, #tpu.memory_space<vmem>>, vector<8x8xf32>
      tpu.vector_store %arg5[%c0_9, %c0_10], %11 {strides = array<i32>} : memref<8x8xf32, #tpu.memory_space<vmem>>, vector<8x8xf32>,
    } else {
    }
    %c0 = arith.constant 0 : index
    %c0_1 = arith.constant 0 : index
    %3 = vector.load %arg3[%c0, %c0_1] : memref<8x32xf32, #tpu.memory_space<vmem>>, vector<8x32xf32>
    %c0_2 = arith.constant 0 : index
    %c0_3 = arith.constant 0 : index
    %4 = vector.load %arg5[%c0_2, %c0_3] : memref<8x8xf32, #tpu.memory_space<vmem>>, vector<8x8xf32>
    %cst = arith.constant dense<0.000000e+00> : vector<8x8xf32>
    %5 = tpu.matmul %3, %3, %cst {dimension_numbers = #tpu.dot_dimension_numbers<[1], [1], [0], [0], [0, 0, 1, 0], [], []>} : vector<8x32xf32>, vector<8x32xf32>, vector<8x8xf32> -> vector<8x8xf32>
    %6 = arith.addf %4, %5 : vector<8x8xf32>
    %c0_4 = arith.constant 0 : index
    %c0_5 = arith.constant 0 : index
    %7 = vector.load %arg5[%c0_4, %c0_5] : memref<8x8xf32, #tpu.memory_space<vmem>>, vector<8x8xf32>
    tpu.vector_store %arg5[%c0_4, %c0_5], %6 {strides = array<i32>} : memref<8x8xf32, #tpu.memory_space<vmem>>, vector<8x8xf32>,
    %c0_i32_6 = arith.constant 0 : i32
    %8 = arith.cmpi eq, %arg0, %c0_i32_6 : i32
    %9 = arith.extui %8 : i1 to i32
    %c0_i32_7 = arith.constant 0 : i32
    %10 = arith.cmpi ne, %9, %c0_i32_7 : i32
    scf.if %10 {
      %c0_8 = arith.constant 0 : index
      %c0_9 = arith.constant 0 : index
      %11 = vector.load %arg5[%c0_8, %c0_9] : memref<8x8xf32, #tpu.memory_space<vmem>>, vector<8x8xf32>
      %c0_10 = arith.constant 0 : index
      %c0_11 = arith.constant 0 : index
      %12 = vector.load %arg1[%c0_10, %c0_11] : memref<8x1xf32, #tpu.memory_space<vmem>>, vector<8x1xf32>
      %c0_12 = arith.constant 0 : index
      %c0_13 = arith.constant 0 : index
      %13 = vector.load %arg2[%c0_12, %c0_13] : memref<1x8xf32, #tpu.memory_space<vmem>>, vector<1x8xf32>
      %14 = vector.broadcast %12 : vector<8x1xf32> to vector<8x8xf32>
      %15 = vector.broadcast %13 : vector<1x8xf32> to vector<8x8xf32>
      %16 = arith.cmpf oeq, %14, %15 : vector<8x8xf32>
      %17 = arith.extui %16 : vector<8x8xi1> to vector<8x8xi32>
      %18 = arith.sitofp %17 : vector<8x8xi32> to vector<8x8xf32>
      %19 = tpu.iota {dimensions = array<i32: 0>} : vector<8x8xi32>
      %20 = tpu.iota {dimensions = array<i32: 1>} : vector<8x8xi32>
      %21 = arith.cmpi eq, %19, %20 : vector<8x8xi32>
      %cst_14 = arith.constant 0.000000e+00 : f32
      %22 = vector.broadcast %cst_14 : f32 to vector<8x8xf32>
      %23 = arith.select %21, %11, %22 : vector<8x8xi1>, vector<8x8xf32>
      %cst_15 = arith.constant dense<0.000000e+00> : vector<8xf32>
      %24 = vector.multi_reduction <add>, %23, %cst_15 [1] : vector<8x8xf32> to vector<8xf32>
      %25 = vector.shape_cast %24 : vector<8xf32> to vector<8x1xf32>
      %cst_16 = arith.constant dense<0.000000e+00> : vector<8xf32>
      %26 = vector.multi_reduction <add>, %23, %cst_16 [0] : vector<8x8xf32> to vector<8xf32>
      %27 = vector.shape_cast %26 : vector<8xf32> to vector<1x8xf32>
      %28 = vector.broadcast %25 : vector<8x1xf32> to vector<8x8xf32>
      %29 = vector.broadcast %27 : vector<1x8xf32> to vector<8x8xf32>
      %30 = arith.addf %28, %29 : vector<8x8xf32>
      %cst_17 = arith.constant 2.000000e+00 : f32
      %31 = vector.broadcast %cst_17 : f32 to vector<8x8xf32>
      %32 = arith.mulf %31, %11 : vector<8x8xf32>
      %33 = arith.subf %30, %32 : vector<8x8xf32>
      %cst_18 = arith.constant 0.000000e+00 : f32
      %34 = vector.broadcast %cst_18 : f32 to vector<8x8xf32>
      %35 = arith.maximumf %33, %34 : vector<8x8xf32>
      %36 = math.sqrt %35 : vector<8x8xf32>
      %cst_19 = arith.constant 1.000000e-01 : f32
      %37 = vector.broadcast %cst_19 : f32 to vector<8x8xf32>
      %38 = arith.mulf %36, %37 : vector<8x8xf32>
      %cst_20 = arith.constant 0.000000e+00 : f32
      %39 = vector.broadcast %cst_20 : f32 to vector<8x8xf32>
      %40 = arith.subf %39, %38 : vector<8x8xf32>
      %cst_21 = arith.constant -1.000000e+30 : f32
      %41 = vector.broadcast %cst_21 : f32 to vector<8x8xf32>
      %42 = arith.select %21, %41, %40 : vector<8x8xi1>, vector<8x8xf32>
      %cst_22 = arith.constant dense<0xFF800000> : vector<8xf32>
      %43 = vector.multi_reduction <maximumf>, %42, %cst_22 [1] : vector<8x8xf32> to vector<8xf32>
      %44 = vector.shape_cast %43 : vector<8xf32> to vector<8x1xf32>
      %45 = vector.broadcast %44 : vector<8x1xf32> to vector<8x8xf32>
      %46 = arith.subf %42, %45 : vector<8x8xf32>
      %47 = math.exp %46 : vector<8x8xf32>
      %cst_23 = arith.constant dense<0.000000e+00> : vector<8xf32>
      %48 = vector.multi_reduction <add>, %47, %cst_23 [1] : vector<8x8xf32> to vector<8xf32>
      %49 = vector.shape_cast %48 : vector<8xf32> to vector<8x1xf32>
      %50 = arith.mulf %47, %18 : vector<8x8xf32>
      %cst_24 = arith.constant dense<0.000000e+00> : vector<8xf32>
      %51 = vector.multi_reduction <add>, %50, %cst_24 [1] : vector<8x8xf32> to vector<8xf32>
      %52 = vector.shape_cast %51 : vector<8xf32> to vector<8x1xf32>
      %cst_25 = arith.constant 0.000000e+00 : f32
      %53 = vector.broadcast %cst_25 : f32 to vector<8x1xf32>
      %54 = arith.cmpf ogt, %52, %53 : vector<8x1xf32>
      %cst_26 = arith.constant 1.000000e+00 : f32
      %55 = vector.broadcast %cst_26 : f32 to vector<8x1xf32>
      %56 = arith.select %54, %52, %55 : vector<8x1xi1>, vector<8x1xf32>
      %57 = math.log %56 : vector<8x1xf32>
      %58 = math.log %49 : vector<8x1xf32>
      %59 = arith.subf %57, %58 : vector<8x1xf32>
      %cst_27 = arith.constant 0.000000e+00 : f32
      %60 = vector.broadcast %cst_27 : f32 to vector<8x1xf32>
      %61 = arith.select %54, %59, %60 : vector<8x1xi1>, vector<8x1xf32>
      %62 = vector.shape_cast %61 : vector<8x1xf32> to vector<1x8x1xf32>
      %cst_28 = arith.constant dense<0.000000e+00> : vector<1xf32>
      %63 = vector.multi_reduction <add>, %62, %cst_28 [1, 2] : vector<1x8x1xf32> to vector<1xf32>
      %64 = vector.shape_cast %63 : vector<1xf32> to vector<1x1x1xf32>
      %65 = vector.extract %64[0, 0, 0] : f32 from vector<1x1x1xf32>
      %66 = arith.extui %54 : vector<8x1xi1> to vector<8x1xi32>
      %67 = arith.sitofp %66 : vector<8x1xi32> to vector<8x1xf32>
      %68 = vector.shape_cast %67 : vector<8x1xf32> to vector<1x8x1xf32>
      %cst_29 = arith.constant dense<0.000000e+00> : vector<1xf32>
      %69 = vector.multi_reduction <add>, %68, %cst_29 [1, 2] : vector<1x8x1xf32> to vector<1xf32>
      %70 = vector.shape_cast %69 : vector<1xf32> to vector<1x1x1xf32>
      %71 = vector.extract %70[0, 0, 0] : f32 from vector<1x1x1xf32>
      %72 = arith.divf %65, %71 : f32
      %cst_30 = arith.constant 0.000000e+00 : f32
      %73 = arith.subf %cst_30, %72 : f32
      %c0_31 = arith.constant 0 : index
      %c0_32 = arith.constant 0 : index
      %74 = memref.load %arg4[%c0_31, %c0_32] : memref<1x1xf32, #tpu.memory_space<smem>>
      memref.store %73, %arg4[%c0_31, %c0_32] : memref<1x1xf32, #tpu.memory_space<smem>>
    } else {
    }
    return
  }
  func.func @transform_0(%arg0: i32) -> (i32, i32) {
    %c0_i32 = arith.constant 0 : i32
    %c0_i32_0 = arith.constant 0 : i32
    %c0_i32_1 = arith.constant 0 : i32
    return %c0_i32, %c0_i32_0 : i32, i32
  }
  func.func @transform_1(%arg0: i32) -> (i32, i32) {
    %c0_i32 = arith.constant 0 : i32
    %c0_i32_0 = arith.constant 0 : i32
    %c0_i32_1 = arith.constant 0 : i32
    return %c0_i32, %c0_i32_0 : i32, i32
  }
  func.func @transform_2(%arg0: i32) -> (i32, i32) {
    %c0_i32 = arith.constant 0 : i32
    %c0_i32_0 = arith.constant 0 : i32
    return %c0_i32, %arg0 : i32, i32
  }
  func.func @transform_3(%arg0: i32) -> (i32, i32) {
    %c0_i32 = arith.constant 0 : i32
    %c0_i32_0 = arith.constant 0 : i32
    %c0_i32_1 = arith.constant 0 : i32
    return %c0_i32, %c0_i32_0 : i32, i32
  }
}

</mosaic_0001>

<bundles_post_ra>
// kernel: tpu_custom_call.1
= control target key start
LH: loop header
LB: loop body
LE: loop exit
PB: predicated region body
PF: predicated region fallthrough
CT: control target
= control target key end

     0   :  { %vm23_vm0 = vcmask 261120   ;;  %vm19_vm1 = vcmask 64512   ;;  %v259_v1 = vmov 0.0   ;;  %vm260_vm2 = vmmov 0   ;;  %s317_s0 = inlined_call_operand.vmem [shape: f32[8,1], index: 0, kind: input, shape index: {}]   ;;  %s318_s1 = inlined_call_operand.vmem [shape: f32[1,8], index: 1, kind: input, shape index: {}]   ;;  %s319_s2 = inlined_call_operand.vmem [shape: f32[8,32], index: 2, kind: input, shape index: {}]   ;;  %s320_s3 = inlined_call_operand.hbm [shape: f32[1,1], index: 3, kind: output, shape index: {}]  }
   0x1   :  { %v21_v0 = vld [vmem:[%s319_s2] sm:$0xff]  ;;  %220 = vmatprep.subr.mxu0 %v259_v1  ;;  %222 = vmatprep.mubr.msk.f32.mxu0 %vm260_vm2, %v259_v1  ;;  %20 = vst.msk [vmem:[#allocation2] sm:$0xff] %vm19_vm1, %v259_v1 }
   0x2   :  { %8 = vsyncpa [#allocation4], 0  ;;  %221 = vmatpush3.xpose.msk.msra.mxu0 %vm23_vm0, %v21_v0  ;;  %v120_v4 = vlaneseq  ;;  %v104_v12 = vld [vmem:[%s317_s0] sm:$0xff]  ;;  %v261_v13 = vmov 0   ;;  %vm170_vm8 = vcmask 7168   ;;  %s247_s22 = scalar_lea.hbm %s320_s3, 16 }
   0x3   :  { %235 = vset.pattern.permute.xlu1 %v261_v13  ;;  %236 = vset.pattern.permute.xlu0 %v261_v13  ;;  %v215_v37 = vld [vmem:[%s318_s1] ss:$0 sm:$0xff]  ;;  %p248_p0 = scmp.ne.s32.totalorder %s320_s3, %s247_s22  ;;  %p251_p1 = scmp.lt.u32.totalorder %s247_s22, %s320_s3 }
   0x4   :  { %v121_v7 = vshrl.u32 %v120_v4, 7  ;;  %v123_v8 = vand.u32 127, %v120_v4  ;;  %108 = vperm.xlu1 %235, %v104_v12  }
   0x5   :  { %223 = vmatmul.mubr.msk.f32.vlgmr.msra.gmra.mrb[0].mxu0 %vm23_vm0, %v21_v0  ;;  %p253_p2 = pnand %p251_p1, %p248_p0 }
   0x6   :  { %vm124_vm3 = vcmp.eq.s32.totalorder %v121_v7, %v123_v8 }
   0x8   :  { %v22_v2 = vld [vmem:[#allocation2] sm:$0xff] }
  0x83   :  { %v109_v38 = vpop.permute.xlu1 %108 }
  0x84   :  { %vm117_vm6 = vcmp.eq.f32.partialorder %v109_v38, %v215_v37 }
  0x85   :  { %v216_v39 = vsel %vm117_vm6, 1.0, %v259_v1 }
  0xd8   :  { %v93_v3 = vpop.f32.mrb[0].mxu0 }
  0xd9   :  { %v97_v5 = vadd.f32 %v93_v3, %v22_v2  ;;  %v224_v6 = vpop.f32.mrb[1].mxu0 }
  0xdb   :  { %99 = vst.msk [vmem:[#allocation2] sm:$0xff] %vm19_vm1, %v97_v5 }
  0xe2   :  { %v103_v9 = vld [vmem:[#allocation2] sm:$0xff] }
  0xe3   :  { %v125_v10 = vsel %vm124_vm3, %v103_v9, 0.0  ;;  %v136_v21 = vmul.f32 2.0, %v103_v9 }
  0xe4   :  { %v126_v11 = vsel %vm19_vm1, %v125_v10, 0.0 }
  0xe5   :  { %127 = vadd.xlane.f32.xlu0 %v126_v11  ;;  %v129_v14 = vrot.slane %v126_v11, 4 }
  0xe7   :  { %v130_v15 = vadd.f32 %v129_v14, %v126_v11 }
  0xe9   :  { %v131_v16 = vrot.slane %v130_v15, 2 }
  0xeb   :  { %v132_v17 = vadd.f32 %v131_v16, %v130_v15 }
  0xed   :  { %v133_v18 = vrot.slane %v132_v17, 1 }
  0xef   :  { %v134_v19 = vadd.f32 %v133_v18, %v132_v17 }
 0x172   :  { %v128_v20 = vpop.xlane.xlu0 %127 }
 0x173   :  { %v135_v22 = vadd.f32 %v134_v19, %v128_v20 }
 0x175   :  { %v137_v23 = vsub.f32 %v135_v22, %v136_v21 }
 0x177   :  { %v138_v24 = vmax.f32 %v137_v23, 0.0 }
 0x179   :  { %237 = vrsqrt.f32 %v138_v24  ;;  %vm141_vm4 = vcmp.eq.f32.partialorder %v138_v24, inf  ;;  %v144_v27 = vand.u32 2147483648, %v138_v24  ;;  %vm143_vm5 = vcmp.eq.f32.partialorder %v138_v24, 0.0 }
 0x183   :  { %v238_v25 = vpop.eup %237 }
 0x184   :  { %v140_v26 = vmul.f32 %v238_v25, %v138_v24 }
 0x186   :  { %v142_v28 = vsel %vm141_vm4, %v138_v24, %v140_v26 }
 0x187   :  { %v145_v29 = vsel %vm143_vm5, %v144_v27, %v142_v28 }
 0x188   :  { %v146_v30 = vmul.f32 0.1, %v145_v29 }
 0x18a   :  { %v147_v31 = vsub.f32 0.0, %v146_v30 }
 0x18c   :  { %v148_v32 = vsel %vm124_vm3, -1e+30, %v147_v31 }
 0x18d   :  { %v149_v33 = vsel %vm19_vm1, %v148_v32, -inf }
 0x18e   :  { %150 = vmax.xlane.f32.xlu0 %v149_v33 }
 0x21b   :  { %v151_v34 = vpop.xlane.xlu0 %150 }
 0x21c   :  { %v152_v35 = vsub.f32 %v148_v32, %v151_v34 }
 0x21e   :  { %v153_v36 = vmul.f32 1.442695, %v152_v35 }
 0x220   :  { %239 = vpow2.f32 %v153_v36 }
 0x22a   :  { %v240_v40 = vpop.eup %239 }
 0x22b   :  { %v155_v41 = vsel %vm19_vm1, %v240_v40, 0.0  ;;  %v158_v42 = vmul.f32 %v240_v40, %v216_v39 }
 0x22c   :  { %156 = vadd.xlane.f32.xlu0 %v155_v41 }
 0x22d   :  { %v159_v43 = vsel %vm19_vm1, %v158_v42, 0.0 }
 0x22e   :  { %160 = vadd.xlane.f32.xlu1 %v159_v43 }
 0x2b9   :  { %v157_v44 = vpop.xlane.xlu0 %156 }
 0x2ba   :  { %241 = vlog2.f32 %v157_v44 }
 0x2bb   :  { %v161_v45 = vpop.xlane.xlu1 %160 }
 0x2bc   :  { %vm162_vm7 = vcmp.gt.f32.partialorder %v161_v45, 0.0 }
 0x2bd   :  { %v163_v46 = vsel %vm162_vm7, %v161_v45, 1.0  ;;  %v217_v54 = vsel %vm162_vm7, 1.0, %v259_v1 }
 0x2be   :  { %243 = vlog2.f32 %v163_v46  ;;  %v183_v55 = vsel %vm170_vm8, %v217_v54, 0.0 }
 0x2c4   :  { %v242_v47 = vpop.eup %241 }
 0x2c5   :  { %v167_v49 = vmul.f32 0.6931472, %v242_v47 }
 0x2c8   :  { %v244_v48 = vpop.eup %243 }
 0x2c9   :  { %v165_v50 = vmul.f32 0.6931472, %v244_v48 }
 0x2cb   :  { %v168_v51 = vsub.f32 %v165_v50, %v167_v49 }
 0x2cd   :  { %v169_v52 = vsel %vm162_vm7, %v168_v51, 0.0 }
 0x2ce   :  { %v171_v53 = vsel %vm170_vm8, %v169_v52, 0.0 }
 0x2cf   :  { %172 = vadd.xlane.f32.xlu0 %v171_v53 }
 0x2d3   :  { %184 = vadd.xlane.f32.xlu0 %v183_v55 }
 0x35c   :  { %v173_v56 = vpop.xlane.xlu0 %172 }
 0x35d   :  { %v174_v57 = vrot.slane %v173_v56, 4 }
 0x35f   :  { %v175_v58 = vadd.f32 %v174_v57, %v173_v56 }
 0x360   :  { %v185_v59 = vpop.xlane.xlu0 %184 }
 0x361   :  { %v176_v60 = vrot.slane %v175_v58, 2  ;;  %v186_v61 = vrot.slane %v185_v59, 4 }
 0x363   :  { %v187_v62 = vadd.f32 %v186_v61, %v185_v59  ;;  %v177_v63 = vadd.f32 %v176_v60, %v175_v58 }
 0x365   :  { %v188_v0 = vrot.slane %v187_v62, 2  ;;  %v178_v2 = vrot.slane %v177_v63, 1 }
 0x367   :  { %v189_v3 = vadd.f32 %v188_v0, %v187_v62  ;;  %v179_v4 = vadd.f32 %v178_v2, %v177_v63 }
 0x369   :  { %225 = vpush %v179_v4  ;;  %v190_v5 = vrot.slane %v189_v3, 1 }
 0x36b   :  { %v191_v6 = vadd.f32 %v190_v5, %v189_v3 }
 0x36d   :  { %227 = vpush %v191_v6 }
 0x39a   :  { %s226_s1 = spop %225 }
 0x39e   :  { %s228_s16 = spop %227 }
 0x39f   :  { %v193_v1 = vstv %s228_s16 }
 0x3a0   :  { %245 = vrcp.f32 %v193_v1 }
 0x3aa   :  { %v246_v7 = vpop.eup %245 }
 0x3ab   :  { %229 = vpush %v246_v7 }
 0x3dc   :  { %s230_s17 = spop %229 }
 0x3dd   :  { %s196_s18 = smul.f32 %s230_s17, %s226_s1 }
 0x3df   :  { %s197_s19 = ssub.f32 0.0, %s196_s18 }
 0x3e1   :  { %199 = sst [smem:[#allocation3]] %s197_s19 }
 0x3e2   :  { %256 = shalt.err (!%p253_p2)
}
 0x3e3   :  { %s262_s27 = smov [#allocation3]  }
 0x3e4   :  { %207 = dma.smem_to_hbm %s262_s27, 16, %s320_s3, [#allocation4]  }
 0x3e5   :  { %257 = dma.done.wait [#allocation4], 16  }
 0x3e6   :  { %258 = vsyncadd [#allocation4], 4294967280 }
 0x3e7   :  { %211 = sfence }
 0x3e8   :  { %212 = vsyncpa [#allocation4], 1 }

</bundles_post_ra>
